<compile_context>
chip_gen: v5e
topology: v5e:2x2
jax: 0.10.0
libtpu: 0.0.40
codegen_flags: <defaults>
</compile_context>

<pallas_src>
import functools

import jax
import jax.numpy as jnp
import numpy as np
from jax.experimental import pallas as pl
from jax.experimental.pallas import tpu as pltpu


def attention_kernel(x_ref, wt_ref, b_ref, v_ref, out_ref, *, matmul_dtype):
    # x_ref  : (Bt, L, F)   activation block (streamed per grid step)
    # wt_ref : (F, C)       context_matrix.T   (resident: constant index map)
    # b_ref  : (1, C)       context_bias       (resident)
    # v_ref  : (1, C)       context_vector.T   (resident)
    # out_ref: (Bt, F + L)  [x_out | alpha] combined slab (single output DMA)
    Bt, L, F = x_ref.shape
    C = wt_ref.shape[1]

    # Any dtype cast happens in-kernel (no extra HBM round-trip of x).
    x = x_ref[...].astype(jnp.float32)

    # Flatten (Bt, L) so the projection is one (Bt*L, F) @ (F, C) MXU matmul.
    # L == 8 (a full sublane tile) keeps this reshape a free re-view; other L
    # values remain correct but may cost a VMEM relayout copy per step.
    x2 = x.reshape(Bt * L, F)
    wt = wt_ref[...]
    if matmul_dtype is not None:
        # Narrow only the MXU operands (v6e/v7x fast path); all VPU/EUP math
        # below stays f32 (required on v5e, harmless elsewhere).
        x2 = x2.astype(matmul_dtype)
        wt = wt.astype(matmul_dtype)

    # u = tanh(x @ W^T + b) -> (Bt*L, C); matmul on the MXU, tanh on the EUP.
    u = jnp.dot(x2, wt, preferred_element_type=jnp.float32) + b_ref[...]
    u = jnp.tanh(u)

    # Scores: lane reduction over the context axis -> (Bt, L).
    scores = jnp.sum(u.reshape(Bt, L, C) * v_ref[...], axis=-1)

    # Softmax over the sequence axis.  Exact division: alpha is a
    # user-visible output of the module.
    m = jnp.max(scores, axis=-1, keepdims=True)
    e = jnp.exp(scores - m)
    alpha = e / jnp.sum(e, axis=-1, keepdims=True)            # (Bt, L)

    # Attention-weighted sum over L on the VPU/XLU.  (An M=1 batched matmul
    # here would waste the MXU on Bt tiny pushes + result-FIFO drains.)
    ctx = jnp.sum(alpha[:, :, None] * x, axis=1)               # (Bt, F)

    out_ref[:, :F] = ctx
    out_ref[:, F:F + L] = alpha


def _pick_block_b(B, L, F):
    """Batch rows per grid step.

    * Single grid step when the whole batch is small enough (avoids the
      ~0.35 us/step pipeline overhead at small problem sizes).
    * Otherwise: a multiple of 8 giving Bt*L >= ~512 MXU rows per step, kept
      under a ~6 MiB double-buffered x block (safe on v5e's 16 MiB scoped and
      v7x's 64 MiB physical VMEM), preferring a divisor of B so the wrapper
      never has to pad/copy x.
    """
    bytes_per_row = max(L * F * 4, 1)
    vmem_rows = max(8, (6 << 20) // bytes_per_row)         # x block <= ~6 MiB
    if B <= min(vmem_rows, max(8, 4096 // max(L, 1))):
        return B                                           # single grid step
    bt = min(vmem_rows, max(8, pl.cdiv(512, L)))           # Bt*L >= ~512
    bt = max(8, (bt // 8) * 8)
    if B >= 8:
        bt = min(bt, (B // 8) * 8)
    for cand in range(bt, 7, -8):                          # prefer divisor of B
        if B % cand == 0:
            return cand
    return bt


def _vmem_limit_bytes(Bt, L, F, C):
    """Explicit scoped-VMEM budget: padded block sizes, double-buffered, 2x
    headroom; capped at 48 MiB so it stays inside v7x's 64 MiB VMEM."""
    lane = lambda n: -(-n // 128) * 128
    sub = lambda n: -(-n // 8) * 8
    x_blk = Bt * sub(L) * lane(F) * 4
    out_blk = sub(Bt) * lane(F + L) * 4
    weights = (sub(F) * lane(C) + 2 * 8 * lane(C)) * 4
    need = 2 * x_blk + 2 * out_blk + 2 * weights
    return int(min(48 << 20, max(8 << 20, 2 * need)))


def attention_forward(x, context_matrix, context_bias, context_vector,
                      *, block_b=None, matmul_dtype=None):
    """x: (B, L, F).  Returns (x_out (B, F) f32, alpha (B, L, 1) f32).

    matmul_dtype: optional MXU-operand dtype (e.g. jnp.bfloat16 on v6e/v7x);
    all elementwise math stays f32.
    """
    B, L, F = x.shape
    C = context_matrix.shape[0]

    Bt = _pick_block_b(B, L, F) if block_b is None else block_b
    n_blocks = pl.cdiv(B, Bt)
    Bp = n_blocks * Bt

    x_p = x
    if Bp != B:
        # Ragged-last-block fallback only (the block picker prefers divisors
        # of B, so the common path has no wrapper-side copy of x).  Explicit
        # zero padding keeps the dead rows finite (uniform softmax) and they
        # are sliced off below.
        x_p = jnp.pad(x, ((0, Bp - B), (0, 0), (0, 0)))

    w_t = context_matrix.T.astype(jnp.float32)                   # (F, C)
    bias = jnp.reshape(context_bias, (1, C)).astype(jnp.float32)  # (1, C)
    v_row = jnp.reshape(context_vector, (1, C)).astype(jnp.float32)  # (1, C)

    kernel = functools.partial(attention_kernel, matmul_dtype=matmul_dtype)

    out = pl.pallas_call(
        kernel,
        out_shape=jax.ShapeDtypeStruct((Bp, F + L), jnp.float32),
        grid_spec=pltpu.PrefetchScalarGridSpec(
            num_scalar_prefetch=0,
            grid=(n_blocks,),
            in_specs=[
                pl.BlockSpec((Bt, L, F), lambda i: (i, 0, 0)),
                # Constant index maps -> weights DMA'd once, stay resident.
                pl.BlockSpec((F, C), lambda i: (0, 0)),
                pl.BlockSpec((1, C), lambda i: (0, 0)),
                pl.BlockSpec((1, C), lambda i: (0, 0)),
            ],
            out_specs=pl.BlockSpec((Bt, F + L), lambda i: (i, 0)),
        ),
        compiler_params=pltpu.CompilerParams(
            dimension_semantics=("parallel",),
            vmem_limit_bytes=_vmem_limit_bytes(Bt, L, F, C)),
    )(x_p, w_t, bias, v_row)

    x_out = out[:B, :F]
    alpha_out = out[:B, F:F + L].reshape(B, L, 1)   # module returns alpha.unsqueeze(-1)
    return x_out, alpha_out


def xavier_uniform(key, shape):
    fan_in, fan_out = shape[1], shape[0]
    bound = float(np.sqrt(6.0 / (fan_in + fan_out)))
    return jax.random.uniform(key, shape, jnp.float32, -bound, bound)


def reference_forward(x, context_matrix, context_bias, context_vector):
    B, L, F = x.shape
    x_att = x.reshape(-1, F)
    u = jnp.tanh(x_att @ context_matrix.T + context_bias)
    uv = (u @ context_vector).reshape(B, L)
    alpha = jax.nn.softmax(uv, axis=1)[..., None]
    x_out = (alpha * x).sum(axis=1)
    return x_out, alpha


if __name__ == "__main__":
    # B=16, L=8, F=C=32: the block picker takes the whole batch in one grid
    # step (no wrapper pad/copy, no per-step overhead at this size).
    B, L, F, C = 16, 8, 32, 32

    key = jax.random.PRNGKey(0)
    k_x, k_w, k_b, k_v = jax.random.split(key, 4)

    x = jax.random.normal(k_x, (B, L, F), jnp.float32)
    context_matrix = xavier_uniform(k_w, (C, F))              # (C, F)
    context_bias = xavier_uniform(k_b, (C, 1)).T              # (1, C)
    context_vector = xavier_uniform(k_v, (C, 1))               # (C, 1)

    x_out_ref, alpha_ref = reference_forward(x, context_matrix, context_bias,
                                             context_vector)

    # f32 path (matches the module's math; softmax uses exact division).
    x_out, alpha = attention_forward(x, context_matrix, context_bias,
                                     context_vector)
    jax.block_until_ready((x_out, alpha))
    np.testing.assert_allclose(np.asarray(x_out), np.asarray(x_out_ref),
                               rtol=1e-2, atol=1e-3)
    np.testing.assert_allclose(np.asarray(alpha), np.asarray(alpha_ref),
                               rtol=1e-2, atol=1e-3)

    # bf16 MXU-operand fast path (v6e/v7x); elementwise math stays f32.
    x_out_bf, alpha_bf = attention_forward(x, context_matrix, context_bias,
                                           context_vector,
                                           matmul_dtype=jnp.bfloat16)
    jax.block_until_ready((x_out_bf, alpha_bf))
    np.testing.assert_allclose(np.asarray(x_out_bf), np.asarray(x_out_ref),
                               rtol=5e-2, atol=5e-3)
    np.testing.assert_allclose(np.asarray(alpha_bf), np.asarray(alpha_ref),
                               rtol=5e-2, atol=5e-3)

    assert x_out.shape == (B, F)
    assert alpha.shape == (B, L, 1)
    print("KERNEL_OK")
</pallas_src>

<mosaic_0001>
module attributes {stable_mosaic.version = 11 : i64} {
  func.func @attention_kernel(%arg0: i32, %arg1: memref<16x8x32xf32, #tpu.memory_space<vmem>>, %arg2: memref<32x32xf32, #tpu.memory_space<vmem>>, %arg3: memref<1x32xf32, #tpu.memory_space<vmem>>, %arg4: memref<1x32xf32, #tpu.memory_space<vmem>>, %arg5: memref<16x40xf32, #tpu.memory_space<vmem>>) attributes {dimension_semantics = [#tpu.dimension_semantics<parallel>], iteration_bounds = array<i64: 1>, scalar_prefetch = 0 : i64, scratch_operands = 0 : i64, tpu.core_type = #tpu.core_type<tc>, window_params = [{transform_indices = @transform_0, window_bounds = array<i64: 16, 8, 32>}, {pipeline_mode = #tpu.pipeline_mode<synchronous>, transform_indices = @transform_1, window_bounds = array<i64: 32, 32>}, {pipeline_mode = #tpu.pipeline_mode<synchronous>, transform_indices = @transform_2, window_bounds = array<i64: 1, 32>}, {pipeline_mode = #tpu.pipeline_mode<synchronous>, transform_indices = @transform_3, window_bounds = array<i64: 1, 32>}, {transform_indices = @transform_4, window_bounds = array<i64: 16, 40>}]} {
    %c0 = arith.constant 0 : index
    %c0_0 = arith.constant 0 : index
    %c0_1 = arith.constant 0 : index
    %0 = vector.load %arg1[%c0, %c0_0, %c0_1] : memref<16x8x32xf32, #tpu.memory_space<vmem>>, vector<16x8x32xf32>
    %1 = vector.shape_cast %0 : vector<16x8x32xf32> to vector<128x32xf32>
    %c0_2 = arith.constant 0 : index
    %c0_3 = arith.constant 0 : index
    %2 = vector.load %arg2[%c0_2, %c0_3] : memref<32x32xf32, #tpu.memory_space<vmem>>, vector<32x32xf32>
    %cst = arith.constant dense<0.000000e+00> : vector<128x32xf32>
    %3 = tpu.matmul %1, %2, %cst {dimension_numbers = #tpu.dot_dimension_numbers<[1], [0], [0], [1], [0, 0, 1, 1], [], []>} : vector<128x32xf32>, vector<32x32xf32>, vector<128x32xf32> -> vector<128x32xf32>
    %c0_4 = arith.constant 0 : index
    %c0_5 = arith.constant 0 : index
    %4 = vector.load %arg3[%c0_4, %c0_5] : memref<1x32xf32, #tpu.memory_space<vmem>>, vector<1x32xf32>
    %5 = vector.broadcast %4 : vector<1x32xf32> to vector<128x32xf32>
    %6 = arith.addf %3, %5 : vector<128x32xf32>
    %7 = math.tanh %6 : vector<128x32xf32>
    %8 = vector.shape_cast %7 : vector<128x32xf32> to vector<16x8x32xf32>
    %c0_6 = arith.constant 0 : index
    %c0_7 = arith.constant 0 : index
    %9 = vector.load %arg4[%c0_6, %c0_7] : memref<1x32xf32, #tpu.memory_space<vmem>>, vector<1x32xf32>
    %10 = vector.shape_cast %9 : vector<1x32xf32> to vector<1x1x32xf32>
    %11 = vector.broadcast %10 : vector<1x1x32xf32> to vector<16x8x32xf32>
    %12 = arith.mulf %8, %11 : vector<16x8x32xf32>
    %cst_8 = arith.constant dense<0.000000e+00> : vector<16x8xf32>
    %13 = vector.multi_reduction <add>, %12, %cst_8 [2] : vector<16x8x32xf32> to vector<16x8xf32>
    %cst_9 = arith.constant dense<0xFF800000> : vector<16xf32>
    %14 = vector.multi_reduction <maximumf>, %13, %cst_9 [1] : vector<16x8xf32> to vector<16xf32>
    %15 = vector.shape_cast %14 : vector<16xf32> to vector<16x1xf32>
    %16 = vector.broadcast %15 : vector<16x1xf32> to vector<16x8xf32>
    %17 = arith.subf %13, %16 : vector<16x8xf32>
    %18 = math.exp %17 : vector<16x8xf32>
    %cst_10 = arith.constant dense<0.000000e+00> : vector<16xf32>
    %19 = vector.multi_reduction <add>, %18, %cst_10 [1] : vector<16x8xf32> to vector<16xf32>
    %20 = vector.shape_cast %19 : vector<16xf32> to vector<16x1xf32>
    %21 = vector.broadcast %20 : vector<16x1xf32> to vector<16x8xf32>
    %22 = arith.divf %18, %21 : vector<16x8xf32>
    %23 = vector.shape_cast %22 : vector<16x8xf32> to vector<16x8x1xf32>
    %24 = vector.broadcast %23 : vector<16x8x1xf32> to vector<16x8x32xf32>
    %25 = arith.mulf %24, %0 : vector<16x8x32xf32>
    %cst_11 = arith.constant dense<0.000000e+00> : vector<16x32xf32>
    %26 = vector.multi_reduction <add>, %25, %cst_11 [1] : vector<16x8x32xf32> to vector<16x32xf32>
    %c0_12 = arith.constant 0 : index
    %c0_13 = arith.constant 0 : index
    %27 = vector.load %arg5[%c0_12, %c0_13] : memref<16x40xf32, #tpu.memory_space<vmem>>, vector<16x32xf32>
    tpu.vector_store %arg5[%c0_12, %c0_13], %26 {strides = array<i32>} : memref<16x40xf32, #tpu.memory_space<vmem>>, vector<16x32xf32>,
    %c0_14 = arith.constant 0 : index
    %c32 = arith.constant 32 : index
    %28 = vector.load %arg5[%c0_14, %c32] : memref<16x40xf32, #tpu.memory_space<vmem>>, vector<16x8xf32>
    tpu.vector_store %arg5[%c0_14, %c32], %22 {strides = array<i32>} : memref<16x40xf32, #tpu.memory_space<vmem>>, vector<16x8xf32>,
    return
  }
  func.func @transform_0(%arg0: i32) -> (i32, i32, i32) {
    %c0_i32 = arith.constant 0 : i32
    %c0_i32_0 = arith.constant 0 : i32
    %c0_i32_1 = arith.constant 0 : i32
    return %arg0, %c0_i32, %c0_i32_0 : i32, i32, i32
  }
  func.func @transform_1(%arg0: i32) -> (i32, i32) {
    %c0_i32 = arith.constant 0 : i32
    %c0_i32_0 = arith.constant 0 : i32
    %c0_i32_1 = arith.constant 0 : i32
    return %c0_i32, %c0_i32_0 : i32, i32
  }
  func.func @transform_2(%arg0: i32) -> (i32, i32) {
    %c0_i32 = arith.constant 0 : i32
    %c0_i32_0 = arith.constant 0 : i32
    %c0_i32_1 = arith.constant 0 : i32
    return %c0_i32, %c0_i32_0 : i32, i32
  }
  func.func @transform_3(%arg0: i32) -> (i32, i32) {
    %c0_i32 = arith.constant 0 : i32
    %c0_i32_0 = arith.constant 0 : i32
    %c0_i32_1 = arith.constant 0 : i32
    return %c0_i32, %c0_i32_0 : i32, i32
  }
  func.func @transform_4(%arg0: i32) -> (i32, i32) {
    %c0_i32 = arith.constant 0 : i32
    %c0_i32_0 = arith.constant 0 : i32
    return %arg0, %c0_i32 : i32, i32
  }
}

</mosaic_0001>

<bundles_post_ra>
// kernel: tpu_custom_call.1
= control target key start
LH: loop header
LB: loop body
LE: loop exit
PB: predicated region body
PF: predicated region fallthrough
CT: control target
= control target key end

     0   :  { %9 = vsyncpa [#allocation3], 0  ;;  %s2016_s0 = inlined_call_operand.hbm [shape: f32[16,8,32], index: 0, kind: input, shape index: {}]   ;;  %s2017_s1 = inlined_call_operand.hbm [shape: f32[32,32], index: 1, kind: input, shape index: {}]   ;;  %s2018_s2 = inlined_call_operand.vmem [shape: f32[1,32], index: 2, kind: input, shape index: {}]   ;;  %s2019_s3 = inlined_call_operand.vmem [shape: f32[1,32], index: 3, kind: input, shape index: {}]   ;;  %s2020_s4 = inlined_call_operand.hbm [shape: f32[16,40], index: 4, kind: output, shape index: {}]  }
   0x1   :  { %10 = vsyncpa [#allocation6], 0 }
   0x2   :  { %11 = vsyncpa [#allocation4], 0  ;;  %s16_s17 = sshll.u32 %s2016_s0, 4  ;;  %s1321_s18 = smov [#allocation2]   ;;  %s17_s17 = int_to_ptr.hbm [resolvable:$true] %s16_s17 }
   0x3   :  { %s18_s19 = sshll.u32 %s1321_s18, 4  ;;  %s29_s22 = sshll.u32 %s2017_s1, 4  ;;  %s19_s19 = int_to_ptr.vmem [resolvable:$true] %s18_s19  ;;  %s30_s22 = int_to_ptr.hbm [resolvable:$true] %s29_s22 }
   0x4   :  { %s1322_s23 = smov 128   ;;  %s1323_s24 = smov 8  }
   0x5   :  { %24 = dma.hbm_to_vmem [thread:$0]  %s17_s17, 2048, %s19_s19, [#allocation3], %s1322_s23, %s1322_s23, %s1323_s24  }
   0x6   :  { %s1324_s25 = smov [#allocation5]  }
   0x7   :  { %s31_s26 = sshll.u32 %s1324_s25, 4  ;;  %s32_s26 = int_to_ptr.vmem [resolvable:$true] %s31_s26 }
   0x8   :  { %37 = dma.hbm_to_vmem [thread:$0]  %s30_s22, 512, %s32_s26, [#allocation6], %s1322_s23, %s1322_s23, %s1323_s24  }
   0x9   :  { %1315 = dma.done.wait [#allocation3], 2048  }
   0xa   :  { %1316 = vsyncadd [#allocation3], 4294965248 }
   0xb   :  { %1317 = dma.done.wait [#allocation6], 512  }
   0xc   :  { %1318 = vsyncadd [#allocation6], 4294966784  ;;  %v69_v0 = vld [vmem:[#allocation5 + $0x18] sm:$0xff]  ;;  %v68_v1 = vld [vmem:[#allocation5 + $0x10] sm:$0xff]  ;;  %vm74_vm0 = vcmask 261120   ;;  %vm306_vm1 = vcmask 1041409  }
   0xd   :  { %135 = vmatpush.msra.mxu0 %v69_v0  ;;  %1109 = vmatpush.msra.mxu2 %v69_v0  ;;  %v67_v2 = vld [vmem:[#allocation5 + $0x8] sm:$0xff]  ;;  %v66_v3 = vld [vmem:[#allocation5] sm:$0xff]  ;;  %v52_v12 = vld [vmem:[#allocation2 + $0x10] sm:$0xff]  ;;  %vm308_vm2 = vcmask 1042434   ;;  %vm310_vm3 = vcmask 1043459   ;;  %vm312_vm4 = vcmask 1044484  }
   0xe   :  { %1110 = vmatpush.msra.mxu3 %v69_v0  ;;  %1108 = vmatpush.msra.mxu1 %v69_v0  ;;  %v50_v4 = vld [vmem:[#allocation2] sm:$0xff]  ;;  %v51_v8 = vld [vmem:[#allocation2 + $0x8] sm:$0xff]  ;;  %v60_v13 = vld [vmem:[#allocation2 + $0x50] sm:$0xff]  ;;  %vm2023_vm5 = vcmask 1045509   ;;  %vm2022_vm6 = vcmask 1046534   ;;  %vm2021_vm7 = vcmask 1047559  }
   0xf   :  { %136 = vmatpush.msra.mxu0 %v68_v1  ;;  %1112 = vmatpush.msra.mxu2 %v68_v1  ;;  %v58_v5 = vld [vmem:[#allocation2 + $0x40] sm:$0xff]  ;;  %v59_v9 = vld [vmem:[#allocation2 + $0x48] sm:$0xff]  ;;  %v64_v14 = vld [vmem:[#allocation2 + $0x70] sm:$0xff]  ;;  %vm329_vm8 = vcmask 64512   ;;  %s1078_s5 = sshll.u32 %s2020_s4, 4  ;;  %s1079_s5 = int_to_ptr.hbm [resolvable:$true] %s1078_s5 }
  0x10   :  { %1113 = vmatpush.msra.mxu3 %v68_v1  ;;  %1111 = vmatpush.msra.mxu1 %v68_v1  ;;  %v62_v6 = vld [vmem:[#allocation2 + $0x60] sm:$0xff]  ;;  %v63_v10 = vld [vmem:[#allocation2 + $0x68] sm:$0xff]  ;;  %v56_v15 = vld [vmem:[#allocation2 + $0x30] sm:$0xff] }
  0x11   :  { %137 = vmatpush.msra.mxu0 %v67_v2  ;;  %1115 = vmatpush.msra.mxu2 %v67_v2  ;;  %v54_v7 = vld [vmem:[#allocation2 + $0x20] sm:$0xff]  ;;  %v55_v11 = vld [vmem:[#allocation2 + $0x28] sm:$0xff]  ;;  %v53_v16 = vld [vmem:[#allocation2 + $0x18] sm:$0xff] }
  0x12   :  { %1116 = vmatpush.msra.mxu3 %v67_v2  ;;  %1114 = vmatpush.msra.mxu1 %v67_v2  ;;  %v61_v17 = vld [vmem:[#allocation2 + $0x58] sm:$0xff]  ;;  %v1383_v20 = vld [vmem:[%s2018_s2] ss:$0 sm:$0xff]  ;;  %s1326_s2 = smov [#allocation7]  }
  0x13   :  { %138 = vmatpush.msra.mxu0 %v66_v3  ;;  %1118 = vmatpush.msra.mxu2 %v66_v3  ;;  %v65_v18 = vld [vmem:[#allocation2 + $0x78] sm:$0xff]  ;;  %v1390_v25 = vld [vmem:[%s2019_s3] ss:$0 sm:$0xff]  ;;  %s1076_s3 = sshll.u32 %s1326_s2, 4  ;;  %s1077_s3 = int_to_ptr.vmem [resolvable:$true] %s1076_s3 }
  0x14   :  { %1119 = vmatpush.msra.mxu3 %v66_v3  ;;  %1092 = vmatmul.msk.f32.vlgmr.msra.gmra.mxu0 %vm74_vm0, %v50_v4  ;;  %v57_v19 = vld [vmem:[#allocation2 + $0x38] sm:$0xff] }
  0x15   :  { %1100 = vmatmul.msk.f32.vlgmr.msra.gmra.mxu2 %vm74_vm0, %v58_v5  ;;  %1104 = vmatmul.msk.f32.vlgmr.msra.gmra.mxu3 %vm74_vm0, %v62_v6 }
  0x16   :  { %1117 = vmatpush.msra.mxu1 %v66_v3 }
  0x17   :  { %1096 = vmatmul.msk.f32.vlgmr.msra.gmra.mxu1 %vm74_vm0, %v54_v7 }
  0x1c   :  { %1093 = vmatmul.msk.f32.gmra.mxu0 %vm74_vm0, %v51_v8 }
  0x1d   :  { %1101 = vmatmul.msk.f32.gmra.mxu2 %vm74_vm0, %v59_v9  ;;  %1105 = vmatmul.msk.f32.gmra.mxu3 %vm74_vm0, %v63_v10 }
  0x1f   :  { %1097 = vmatmul.msk.f32.gmra.mxu1 %vm74_vm0, %v55_v11 }
  0x24   :  { %1094 = vmatmul.msk.f32.gmra.mxu0 %vm74_vm0, %v52_v12 }
  0x25   :  { %1102 = vmatmul.msk.f32.gmra.mxu2 %vm74_vm0, %v60_v13  ;;  %1106 = vmatmul.msk.f32.gmra.mxu3 %vm74_vm0, %v64_v14 }
  0x27   :  { %1098 = vmatmul.msk.f32.gmra.mxu1 %vm74_vm0, %v56_v15 }
  0x2c   :  { %1095 = vmatmul.msk.f32.gmra.mxu0 %vm74_vm0, %v53_v16 }
  0x2d   :  { %1103 = vmatmul.msk.f32.gmra.mxu2 %vm74_vm0, %v61_v17  ;;  %1107 = vmatmul.msk.f32.gmra.mxu3 %vm74_vm0, %v65_v18 }
  0x2f   :  { %1099 = vmatmul.msk.f32.gmra.mxu1 %vm74_vm0, %v57_v19 }
  0x91   :  { %v140_v21 = vpop.f32.mrf.mxu0 }
  0x92   :  { %v141_v22 = vadd.f32 %v1383_v20, %v140_v21 }
  0x94   :  { %1131 = vtanh.f32 %v141_v22  ;;  %v152_v23 = vpop.f32.mrf.mxu1 }
  0x95   :  { %v153_v24 = vadd.f32 %v1383_v20, %v152_v23 }
  0x97   :  { %1133 = vtanh.f32 %v153_v24 }
  0x98   :  { %v164_v26 = vpop.f32.mrf.mxu2  ;;  %v176_v27 = vpop.f32.mrf.mxu3 }
  0x99   :  { %v165_v28 = vadd.f32 %v1383_v20, %v164_v26  ;;  %v177_v29 = vadd.f32 %v1383_v20, %v176_v27  ;;  %v143_v30 = vpop.f32.mrf.mxu0 }
  0x9a   :  { %v1132_v31 = vpop.eup %1131  ;;  %v144_v33 = vadd.f32 %v1383_v20, %v143_v30 }
  0x9b   :  { %1135 = vtanh.f32 %v165_v28  ;;  %v208_v32 = vmul.f32 %v1132_v31, %v1390_v25 }
  0x9c   :  { %1137 = vtanh.f32 %v177_v29  ;;  %v155_v34 = vpop.f32.mrf.mxu1 }
  0x9d   :  { %v1134_v35 = vpop.eup %1133  ;;  %v224_v36 = vsel %vm74_vm0, %v208_v32, 0.0  ;;  %v156_v37 = vadd.f32 %v1383_v20, %v155_v34 }
  0x9e   :  { %225 = vadd.xlane.f32.xlu0 %v224_v36  ;;  %v212_v38 = vmul.f32 %v1134_v35, %v1390_v25 }
  0x9f   :  { %1139 = vtanh.f32 %v156_v37 }
  0xa0   :  { %1141 = vtanh.f32 %v144_v33  ;;  %v167_v39 = vpop.f32.mrf.mxu2  ;;  %v179_v40 = vpop.f32.mrf.mxu3  ;;  %v236_v41 = vsel %vm74_vm0, %v212_v38, 0.0 }
  0xa1   :  { %v1136_v42 = vpop.eup %1135  ;;  %v168_v43 = vadd.f32 %v1383_v20, %v167_v39  ;;  %v180_v44 = vadd.f32 %v1383_v20, %v179_v40  ;;  %237 = vadd.xlane.f32.xlu2 %v236_v41  ;;  %v146_v45 = vpop.f32.mrf.mxu0 }
  0xa2   :  { %v1138_v46 = vpop.eup %1137  ;;  %v216_v47 = vmul.f32 %v1136_v42, %v1390_v25  ;;  %v147_v48 = vadd.f32 %v1383_v20, %v146_v45  ;;  %v288_v45 = vlaneseq }
  0xa3   :  { %v220_v49 = vmul.f32 %v1138_v46, %v1390_v25  ;;  %1143 = vtanh.f32 %v180_v44 }
  0xa4   :  { %v248_v50 = vsel %vm74_vm0, %v216_v47, 0.0  ;;  %v158_v51 = vpop.f32.mrf.mxu1  ;;  %1145 = vtanh.f32 %v168_v43 }
  0xa5   :  { %v1140_v52 = vpop.eup %1139  ;;  %249 = vadd.xlane.f32.xlu1 %v248_v50  ;;  %v260_v53 = vsel %vm74_vm0, %v220_v49, 0.0  ;;  %v159_v54 = vadd.f32 %v1383_v20, %v158_v51  ;;  %1147 = vtanh.f32 %v147_v48  ;;  %v1454_v49 = vand.u32 127, %v288_v45 }
  0xa6   :  { %v1142_v55 = vpop.eup %1141  ;;  %261 = vadd.xlane.f32.xlu0 %v260_v53  ;;  %v213_v56 = vmul.f32 %v1140_v52, %v1390_v25 }
  0xa7   :  { %1149 = vtanh.f32 %v159_v54  ;;  %v209_v60 = vmul.f32 %v1142_v55, %v1390_v25 }
  0xa8   :  { %v170_v57 = vpop.f32.mrf.mxu2  ;;  %v182_v58 = vpop.f32.mrf.mxu3  ;;  %v239_v63 = vsel %vm74_vm0, %v213_v56, 0.0 }
  0xa9   :  { %v171_v59 = vadd.f32 %v1383_v20, %v170_v57  ;;  %v149_v61 = vpop.f32.mrf.mxu0  ;;  %v1144_v62 = vpop.eup %1143  ;;  %v227_v6 = vsel %vm74_vm0, %v209_v60, 0.0  ;;  %v183_v12 = vadd.f32 %v1383_v20, %v182_v58 }
  0xaa   :  { %v150_v0 = vadd.f32 %v1383_v20, %v149_v61  ;;  %v1146_v1 = vpop.eup %1145  ;;  %v221_v2 = vmul.f32 %v1144_v62, %v1390_v25 }
  0xab   :  { %v1148_v3 = vpop.eup %1147  ;;  %1151 = vtanh.f32 %v171_v59  ;;  %v217_v7 = vmul.f32 %v1146_v1, %v1390_v25 }
  0xac   :  { %v263_v5 = vsel %vm74_vm0, %v221_v2, 0.0  ;;  %1153 = vtanh.f32 %v150_v0  ;;  %v161_v8 = vpop.f32.mrf.mxu1  ;;  %v210_v9 = vmul.f32 %v1148_v3, %v1390_v25 }
  0xad   :  { %v1150_v4 = vpop.eup %1149  ;;  %240 = vadd.xlane.f32.xlu1 %v239_v63  ;;  %264 = vadd.xlane.f32.xlu2 %v263_v5  ;;  %v162_v15 = vadd.f32 %v1383_v20, %v161_v8  ;;  %v251_v16 = vsel %vm74_vm0, %v217_v7, 0.0 }
  0xae   :  { %228 = vadd.xlane.f32.xlu0 %v227_v6  ;;  %v214_v10 = vmul.f32 %v1150_v4, %v1390_v25  ;;  %v230_v19 = vsel %vm74_vm0, %v210_v9, 0.0 }
  0xb0   :  { %v173_v11 = vpop.f32.mrf.mxu2  ;;  %v185_v13 = vpop.f32.mrf.mxu3  ;;  %v242_v21 = vsel %vm74_vm0, %v214_v10, 0.0 }
  0xb1   :  { %v174_v14 = vadd.f32 %v1383_v20, %v173_v11  ;;  %v186_v17 = vadd.f32 %v1383_v20, %v185_v13  ;;  %v1152_v18 = vpop.eup %1151 }
  0xb2   :  { %v1154_v22 = vpop.eup %1153  ;;  %v218_v23 = vmul.f32 %v1152_v18, %v1390_v25 }
  0xb3   :  { %1155 = vtanh.f32 %v174_v14  ;;  %v211_v24 = vmul.f32 %v1154_v22, %v1390_v25 }
  0xb4   :  { %1157 = vtanh.f32 %v183_v12  ;;  %v254_v29 = vsel %vm74_vm0, %v218_v23, 0.0 }
  0xb5   :  { %252 = vadd.xlane.f32.xlu1 %v251_v16  ;;  %1159 = vtanh.f32 %v162_v15  ;;  %231 = vadd.xlane.f32.xlu2 %v230_v19  ;;  %v233_v30 = vsel %vm74_vm0, %v211_v24, 0.0 }
  0xb6   :  { %243 = vadd.xlane.f32.xlu0 %v242_v21  ;;  %1161 = vtanh.f32 %v186_v17 }
  0xb9   :  { %v1156_v26 = vpop.eup %1155 }
  0xba   :  { %v1158_v27 = vpop.eup %1157  ;;  %v219_v20 = vmul.f32 %v1156_v26, %v1390_v25  ;;  %v1325_v26 = vmov 0  }
  0xbb   :  { %v1160_v28 = vpop.eup %1159  ;;  %v222_v33 = vmul.f32 %v1158_v27, %v1390_v25  ;;  %1128 = vset.pattern.permute.xlu2 %v1325_v26  ;;  %1127 = vset.pattern.permute.xlu1 %v1325_v26 }
  0xbc   :  { %v1162_v31 = vpop.eup %1161  ;;  %v257_v32 = vsel %vm74_vm0, %v219_v20, 0.0  ;;  %v215_v34 = vmul.f32 %v1160_v28, %v1390_v25  ;;  %1126 = vset.pattern.permute.xlu0 %v1325_v26 }
  0xbd   :  { %258 = vadd.xlane.f32.xlu1 %v257_v32  ;;  %255 = vadd.xlane.f32.xlu2 %v254_v29  ;;  %v223_v35 = vmul.f32 %v1162_v31, %v1390_v25  ;;  %v266_v36 = vsel %vm74_vm0, %v222_v33, 0.0 }
  0xbe   :  { %234 = vadd.xlane.f32.xlu0 %v233_v30  ;;  %v245_v37 = vsel %vm74_vm0, %v215_v34, 0.0 }
  0xbf   :  { %v269_v38 = vsel %vm74_vm0, %v223_v35, 0.0 }
  0xc5   :  { %267 = vadd.xlane.f32.xlu1 %v266_v36  ;;  %246 = vadd.xlane.f32.xlu2 %v245_v37 }
  0xc6   :  { %270 = vadd.xlane.f32.xlu0 %v269_v38 }
 0x111   :  { %v1438_v39 = vpop.xlane.xlu0 %225 }
 0x112   :  { %v290_v53 = vperm.slane %v1438_v39, %v1454_v49 }
 0x114   :  { %v1440_v40 = vpop.xlane.xlu2 %237 }
 0x115   :  { %v294_v62 = vperm.slane %v1440_v40, %v1454_v49 }
 0x118   :  { %v1442_v41 = vpop.xlane.xlu1 %249 }
 0x119   :  { %v1444_v42 = vpop.xlane.xlu0 %261  ;;  %v298_v55 = vperm.slane %v1442_v41, %v1454_v49 }
 0x11a   :  { %v302_v3 = vperm.slane %v1444_v42, %v1454_v49 }
 0x120   :  { %v1446_v43 = vpop.xlane.xlu1 %240  ;;  %v1448_v25 = vpop.xlane.xlu2 %264 }
 0x121   :  { %v229_v44 = vpop.xlane.xlu0 %228  ;;  %v295_v6 = vperm.slane %v1446_v43, %v1454_v49  ;;  %v303_v8 = vperm.slane %v1448_v25, %v1454_v49 }
 0x122   :  { %v291_v50 = vperm.slane %v229_v44, %v1454_v49 }
 0x124   :  { %v307_v59 = vsel %vm306_vm1, %v291_v50, %v290_v53 }
 0x128   :  { %v1450_v46 = vpop.xlane.xlu1 %252  ;;  %v232_v47 = vpop.xlane.xlu2 %231 }
 0x129   :  { %v1452_v48 = vpop.xlane.xlu0 %243  ;;  %v299_v51 = vperm.slane %v1450_v46, %v1454_v49  ;;  %v292_v52 = vperm.slane %v232_v47, %v1454_v49 }
 0x12a   :  { %v296_v11 = vperm.slane %v1452_v48, %v1454_v49 }
 0x12b   :  { %v320_v63 = vsel %vm306_vm1, %v299_v51, %v298_v55  ;;  %v309_v0 = vsel %vm308_vm2, %v292_v52, %v307_v59 }
 0x130   :  { %v1462_v54 = vpop.xlane.xlu1 %258  ;;  %v1468_v57 = vpop.xlane.xlu2 %255 }
 0x131   :  { %v301_v56 = vperm.slane %v1462_v54, %v1454_v49  ;;  %v235_v58 = vpop.xlane.xlu0 %234  ;;  %v300_v60 = vperm.slane %v1468_v57, %v1454_v49 }
 0x132   :  { %v293_v61 = vperm.slane %v235_v58, %v1454_v49 }
 0x133   :  { %v321_v1 = vsel %vm308_vm2, %v300_v60, %v320_v63 }
 0x134   :  { %v311_v2 = vsel %vm310_vm3, %v293_v61, %v309_v0  ;;  %v322_v4 = vsel %vm310_vm3, %v301_v56, %v321_v1 }
 0x135   :  { %v313_v5 = vsel %vm312_vm4, %v294_v62, %v311_v2  ;;  %v323_v7 = vsel %vm312_vm4, %v302_v3, %v322_v4 }
 0x136   :  { %v315_v10 = vsel %vm2023_vm5, %v295_v6, %v313_v5  ;;  %v324_v17 = vsel %vm2023_vm5, %v303_v8, %v323_v7 }
 0x137   :  { %v317_v18 = vsel %vm2022_vm6, %v296_v11, %v315_v10 }
 0x138   :  { %v1489_v9 = vpop.xlane.xlu1 %267  ;;  %v247_v13 = vpop.xlane.xlu2 %246 }
 0x139   :  { %v304_v12 = vperm.slane %v1489_v9, %v1454_v49  ;;  %v1496_v14 = vpop.xlane.xlu0 %270  ;;  %v297_v15 = vperm.slane %v247_v13, %v1454_v49 }
 0x13a   :  { %v305_v16 = vperm.slane %v1496_v14, %v1454_v49 }
 0x13b   :  { %v325_v19 = vsel %vm2022_vm6, %v304_v12, %v324_v17  ;;  %v319_v21 = vsel %vm2021_vm7, %v297_v15, %v317_v18 }
 0x13c   :  { %v326_v22 = vsel %vm2021_vm7, %v305_v16, %v325_v19  ;;  %v330_v23 = vsel %vm329_vm8, %v319_v21, -inf }
 0x13d   :  { %v333_v24 = vsel %vm329_vm8, %v326_v22, -inf  ;;  %331 = vmax.xlane.f32.xlu1 %v330_v23 }
 0x13e   :  { %334 = vmax.xlane.f32.xlu2 %v333_v24 }
 0x1b0   :  { %v332_v27 = vpop.xlane.xlu1 %331 }
 0x1b1   :  { %v339_v20 = vperm.slane %v332_v27, 1  ;;  %v338_v28 = vperm.slane %v332_v27, 0  ;;  %v340_v29 = vperm.slane %v332_v27, 2  ;;  %v342_v33 = vperm.slane %v332_v27, 4  ;;  %v1510_v51 = vpop.xlane.xlu2 %334 }
 0x1b2   :  { %v345_v34 = vperm.slane %v332_v27, 7  ;;  %v341_v35 = vperm.slane %v332_v27, 3  ;;  %v343_v59 = vperm.slane %v332_v27, 5  ;;  %v347_v0 = vperm.slane %v1510_v51, 1 }
 0x1b3   :  { %v371_v30 = vsub.f32 %v229_v44, %v339_v20  ;;  %v370_v31 = vsub.f32 %v1438_v39, %v338_v28  ;;  %v372_v32 = vsub.f32 %v232_v47, %v340_v29  ;;  %v374_v45 = vsub.f32 %v1440_v40, %v342_v33 }
 0x1b4   :  { %v377_v50 = vsub.f32 %v247_v13, %v345_v34  ;;  %v373_v52 = vsub.f32 %v235_v58, %v341_v35  ;;  %v344_v44 = vperm.slane %v332_v27, 6  ;;  %v348_v39 = vperm.slane %v1510_v51, 2 }
 0x1b5   :  { %v388_v36 = vmul.f32 1.442695, %v371_v30  ;;  %v386_v37 = vmul.f32 1.442695, %v370_v31  ;;  %v390_v38 = vmul.f32 1.442695, %v372_v32  ;;  %v375_v62 = vsub.f32 %v1446_v43, %v343_v59 }
 0x1b6   :  { %v394_v53 = vmul.f32 1.442695, %v374_v45  ;;  %v400_v55 = vmul.f32 1.442695, %v377_v50  ;;  %v392_v56 = vmul.f32 1.442695, %v373_v52  ;;  %v376_v58 = vsub.f32 %v1452_v48, %v344_v44 }
 0x1b7   :  { %1163 = vpow2.f32 %v388_v36  ;;  %v380_v61 = vsub.f32 %v1468_v57, %v348_v39  ;;  %v351_v2 = vperm.slane %v1510_v51, 5  ;;  %v396_v4 = vmul.f32 1.442695, %v375_v62 }
 0x1b8   :  { %1165 = vpow2.f32 %v386_v37  ;;  %v398_v63 = vmul.f32 1.442695, %v376_v58  ;;  %v346_v5 = vperm.slane %v1510_v51, 0  ;;  %v379_v43 = vsub.f32 %v1450_v46, %v347_v0 }
 0x1b9   :  { %1167 = vpow2.f32 %v390_v38  ;;  %v406_v1 = vmul.f32 1.442695, %v380_v61  ;;  %v383_v57 = vsub.f32 %v1448_v25, %v351_v2  ;;  %v350_v10 = vperm.slane %v1510_v51, 4 }
 0x1ba   :  { %1169 = vpow2.f32 %v394_v53  ;;  %v378_v7 = vsub.f32 %v1442_v41, %v346_v5  ;;  %v404_v8 = vmul.f32 1.442695, %v379_v43  ;;  %v349_v15 = vperm.slane %v1510_v51, 3 }
 0x1bb   :  { %1171 = vpow2.f32 %v400_v55  ;;  %v412_v11 = vmul.f32 1.442695, %v383_v57  ;;  %v382_v41 = vsub.f32 %v1444_v42, %v350_v10  ;;  %v353_v18 = vperm.slane %v1510_v51, 7 }
 0x1bc   :  { %1173 = vpow2.f32 %v392_v56  ;;  %v402_v13 = vmul.f32 1.442695, %v378_v7  ;;  %v381_v25 = vsub.f32 %v1462_v54, %v349_v15  ;;  %v352_v22 = vperm.slane %v1510_v51, 6 }
 0x1bd   :  { %v1513_v47 = vpop.eup %1163  ;;  %1175 = vpow2.f32 %v398_v63  ;;  %v410_v17 = vmul.f32 1.442695, %v382_v41  ;;  %v385_v42 = vsub.f32 %v1496_v14, %v353_v18 }
 0x1be   :  { %v1515_v60 = vpop.eup %1165  ;;  %438 = vperm.xlu1 %1127, %v1513_v47   ;;  %1177 = vpow2.f32 %v406_v1  ;;  %v408_v21 = vmul.f32 1.442695, %v381_v25  ;;  %v384_v54 = vsub.f32 %v1489_v9, %v352_v22 }
 0x1bf   :  { %v1518_v40 = vpop.eup %1167  ;;  %435 = vperm.xlu0 %1126, %v1515_v60   ;;  %1179 = vpow2.f32 %v396_v4  ;;  %v416_v26 = vmul.f32 1.442695, %v385_v42 }
 0x1c0   :  { %441 = vperm.xlu2 %1128, %v1518_v40   ;;  %v1527_v3 = vpop.eup %1169  ;;  %1181 = vpow2.f32 %v404_v8  ;;  %v414_v20 = vmul.f32 1.442695, %v384_v54 }
 0x1c1   :  { %v1530_v48 = vpop.eup %1171  ;;  %1183 = vpow2.f32 %v412_v11 }
 0x1c2   :  { %v1533_v6 = vpop.eup %1173  ;;  %1185 = vpow2.f32 %v402_v13 }
 0x1c3   :  { %v1541_v12 = vpop.eup %1175  ;;  %1187 = vpow2.f32 %v410_v17 }
 0x1c4   :  { %v1544_v16 = vpop.eup %1177  ;;  %1189 = vpow2.f32 %v408_v21 }
 0x1c5   :  { %v1547_v46 = vpop.eup %1179  ;;  %1191 = vpow2.f32 %v416_v26 }
 0x1c6   :  { %447 = vperm.xlu1 %1127, %v1527_v3   ;;  %v1554_v19 = vpop.eup %1181  ;;  %1193 = vpow2.f32 %v414_v20 }
 0x1c7   :  { %456 = vperm.xlu0 %1126, %v1530_v48   ;;  %v1557_v23 = vpop.eup %1183 }
 0x1c8   :  { %444 = vperm.xlu2 %1128, %v1533_v6   ;;  %v1560_v24 = vpop.eup %1185 }
 0x1c9   :  { %v1566_v27 = vpop.eup %1187 }
 0x1ca   :  { %v1569_v28 = vpop.eup %1189 }
 0x1cb   :  { %v1572_v29 = vpop.eup %1191 }
 0x1cc   :  { %v1575_v14 = vpop.eup %1193 }
 0x1ce   :  { %453 = vperm.xlu1 %1127, %v1541_v12  }
 0x1cf   :  { %465 = vperm.xlu0 %1126, %v1544_v16  }
 0x1d0   :  { %450 = vperm.xlu2 %1128, %v1547_v46  }
 0x1d6   :  { %462 = vperm.xlu1 %1127, %v1554_v19  }
 0x1d7   :  { %474 = vperm.xlu0 %1126, %v1557_v23  }
 0x1d8   :  { %459 = vperm.xlu2 %1128, %v1560_v24  }
 0x1de   :  { %471 = vperm.xlu1 %1127, %v1566_v27  }
 0x1e0   :  { %468 = vperm.xlu2 %1128, %v1569_v28  }
 0x1e6   :  { %480 = vperm.xlu1 %1127, %v1572_v29  }
 0x1e8   :  { %477 = vperm.xlu2 %1128, %v1575_v14  }
 0x21a   :  { %v442_v9 = vpop.permute.xlu2 %441 }
 0x21b   :  { %v484_v38 = vperm.slane %v442_v9, %v1454_v49 }
 0x222   :  { %v445_v30 = vpop.permute.xlu2 %444 }
 0x223   :  { %v485_v51 = vperm.slane %v445_v30, %v1454_v49 }
 0x22a   :  { %v451_v35 = vpop.permute.xlu2 %450 }
 0x22b   :  { %v487_v55 = vperm.slane %v451_v35, %v1454_v49 }
 0x230   :  { %v439_v31 = vpop.permute.xlu1 %438 }
 0x231   :  { %v436_v32 = vpop.permute.xlu0 %435  ;;  %v483_v33 = vperm.slane %v439_v31, %v1454_v49 }
 0x232   :  { %v482_v34 = vperm.slane %v436_v32, %v1454_v49  ;;  %v460_v56 = vpop.permute.xlu2 %459 }
 0x233   :  { %v490_v5 = vperm.slane %v460_v56, %v1454_v49 }
 0x234   :  { %v498_v36 = vsel %vm306_vm1, %v483_v33, %v482_v34 }
 0x235   :  { %v499_v45 = vsel %vm308_vm2, %v484_v38, %v498_v36 }
 0x236   :  { %v500_v52 = vsel %vm310_vm3, %v485_v51, %v499_v45 }
 0x238   :  { %v448_v37 = vpop.permute.xlu1 %447 }
 0x239   :  { %v486_v50 = vperm.slane %v448_v37, %v1454_v49  ;;  %v457_v53 = vpop.permute.xlu0 %456 }
 0x23a   :  { %v489_v58 = vperm.slane %v457_v53, %v1454_v49  ;;  %v469_v43 = vpop.permute.xlu2 %468 }
 0x23b   :  { %v501_v44 = vsel %vm312_vm4, %v486_v50, %v500_v52  ;;  %v493_v11 = vperm.slane %v469_v43, %v1454_v49 }
 0x23c   :  { %v502_v61 = vsel %vm2023_vm5, %v487_v55, %v501_v44 }
 0x240   :  { %v454_v39 = vpop.permute.xlu1 %453 }
 0x241   :  { %v488_v59 = vperm.slane %v454_v39, %v1454_v49  ;;  %v466_v1 = vpop.permute.xlu0 %465 }
 0x242   :  { %v492_v7 = vperm.slane %v466_v1, %v1454_v49  ;;  %v478_v17 = vpop.permute.xlu2 %477 }
 0x243   :  { %v503_v62 = vsel %vm2022_vm6, %v488_v59, %v502_v61  ;;  %v496_v22 = vperm.slane %v478_v17, %v1454_v49 }
 0x244   :  { %v504_v63 = vsel %vm2021_vm7, %v489_v58, %v503_v62 }
 0x245   :  { %v514_v0 = vsel %vm329_vm8, %v504_v63, 0.0 }
 0x246   :  { %515 = vadd.xlane.f32.xlu0 %v514_v0 }
 0x248   :  { %v463_v2 = vpop.permute.xlu1 %462 }
 0x249   :  { %v491_v4 = vperm.slane %v463_v2, %v1454_v49  ;;  %v475_v15 = vpop.permute.xlu0 %474 }
 0x24a   :  { %v495_v18 = vperm.slane %v475_v15, %v1454_v49 }
 0x24b   :  { %v505_v57 = vsel %vm306_vm1, %v491_v4, %v490_v5 }
 0x24c   :  { %v506_v8 = vsel %vm308_vm2, %v492_v7, %v505_v57 }
 0x24d   :  { %v507_v41 = vsel %vm310_vm3, %v493_v11, %v506_v8 }
 0x250   :  { %v472_v10 = vpop.permute.xlu1 %471 }
 0x251   :  { %v494_v13 = vperm.slane %v472_v10, %v1454_v49 }
 0x253   :  { %v508_v25 = vsel %vm312_vm4, %v494_v13, %v507_v41 }
 0x254   :  { %v509_v21 = vsel %vm2023_vm5, %v495_v18, %v508_v25 }
 0x255   :  { %v510_v26 = vsel %vm2022_vm6, %v496_v22, %v509_v21 }
 0x258   :  { %v481_v42 = vpop.permute.xlu1 %480 }
 0x259   :  { %v497_v54 = vperm.slane %v481_v42, %v1454_v49 }
 0x25b   :  { %v511_v20 = vsel %vm2021_vm7, %v497_v54, %v510_v26 }
 0x25c   :  { %v517_v9 = vsel %vm329_vm8, %v511_v20, 0.0 }
 0x25d   :  { %518 = vadd.xlane.f32.xlu2 %v517_v9 }
 0x2b9   :  { %v1610_v30 = vpop.xlane.xlu0 %515 }
 0x2ba   :  { %v522_v31 = vperm.slane %v1610_v30, 0  ;;  %v1614_v32 = vperm.slane %v1610_v30, 1  ;;  %v1617_v33 = vperm.slane %v1610_v30, 2  ;;  %v1620_v34 = vperm.slane %v1610_v30, 3 }
 0x2bb   :  { %v528_v35 = vperm.slane %v1610_v30, 6  ;;  %v1626_v36 = vperm.slane %v1610_v30, 4  ;;  %v1641_v56 = vperm.slane %v1610_v30, 5 }
 0x2bc   :  { %1195 = vrcp.f32 %v522_v31  ;;  %v563_v51 = vand.u32 2147483647, %v522_v31  ;;  %v565_v55 = vand.u32 2147483648, %v522_v31  ;;  %vm559_vm10 = vweird.f32 %v522_v31 }
 0x2bd   :  { %1197 = vrcp.f32 %v1614_v32  ;;  %v653_v59 = vand.u32 2147483647, %v528_v35  ;;  %vm649_vm9 = vweird.f32 %v528_v35  ;;  %v655_v0 = vand.u32 2147483648, %v528_v35 }
 0x2be   :  { %1199 = vrcp.f32 %v1617_v33  ;;  %vm1645_vm12 = vcmp.eq.f32.partialorder %v563_v51, 8.507059e+37  ;;  %v566_v7 = vor.u32 1.1754944e-38, %v565_v55  ;;  %vm574_vm15 = vweird.f32 %v1614_v32 }
 0x2bf   :  { %1201 = vrcp.f32 %v1620_v34  ;;  %vm1652_vm13 = vcmp.eq.f32.partialorder %v653_v59, 8.507059e+37  ;;  %v578_v11 = vand.u32 2147483647, %v1614_v32  ;;  %v580_v13 = vand.u32 2147483648, %v1614_v32 }
 0x2c0   :  { %1203 = vrcp.f32 %v528_v35  ;;  %v656_v17 = vor.u32 1.1754944e-38, %v655_v0  ;;  %v608_v1 = vand.u32 2147483647, %v1620_v34 }
 0x2c1   :  { %1205 = vrcp.f32 %v1626_v36 }
 0x2c2   :  { %v1196_v37 = vpop.eup %1195  ;;  %1207 = vrcp.f32 %v1641_v56 }
 0x2c3   :  { %v1629_v38 = vpop.eup %1197  ;;  %v555_v45 = vmul.f32 %v1196_v37, %v522_v31  ;;  %vm560_vm11 = vweird.f32 %v1196_v37  ;;  %v593_v31 = vand.u32 2147483647, %v1617_v33 }
 0x2c4   :  { %v1632_v50 = vpop.eup %1199  ;;  %v570_v52 = vmul.f32 %v1629_v38, %v1614_v32  ;;  %vm561_vm14 = vmor %vm559_vm10, %vm560_vm11  ;;  %vm575_vm8 = vweird.f32 %v1629_v38  ;;  %v595_v32 = vand.u32 2147483648, %v1617_v33 }
 0x2c5   :  { %v1636_v53 = vpop.eup %1201  ;;  %v556_v44 = vsub.f32 1.0, %v555_v45  ;;  %v585_v39 = vmul.f32 %v1632_v50, %v1617_v33  ;;  %vm1671_vm11 = vmor %vm574_vm15, %vm575_vm8  ;;  %v581_v45 = vor.u32 1.1754944e-38, %v580_v13  ;;  %vm590_vm8 = vweird.f32 %v1632_v50 }
 0x2c6   :  { %v571_v58 = vsub.f32 1.0, %v570_v52  ;;  %v600_v61 = vmul.f32 %v1636_v53, %v1620_v34  ;;  %v1204_v63 = vpop.eup %1203  ;;  %vm605_vm7 = vweird.f32 %v1636_v53  ;;  %v623_v13 = vand.u32 2147483647, %v1626_v36 }
 0x2c7   :  { %v557_v62 = vmul.f32 %v1196_v37, %v556_v44  ;;  %v586_v4 = vsub.f32 1.0, %v585_v39  ;;  %v1650_v5 = vpop.eup %1205  ;;  %v645_v43 = vmul.f32 %v1204_v63, %v528_v35  ;;  %vm650_vm10 = vweird.f32 %v1204_v63 }
 0x2c8   :  { %v572_v2 = vmul.f32 %v1629_v38, %v571_v58  ;;  %v601_v8 = vsub.f32 1.0, %v600_v61  ;;  %v615_v22 = vmul.f32 %v1650_v5, %v1626_v36  ;;  %vm651_vm15 = vmor %vm649_vm9, %vm650_vm10  ;;  %vm604_vm9 = vweird.f32 %v1620_v34 }
 0x2c9   :  { %v558_v57 = vadd.f32 %v1196_v37, %v557_v62  ;;  %v646_v15 = vsub.f32 1.0, %v645_v43  ;;  %v587_v21 = vmul.f32 %v1632_v50, %v586_v4  ;;  %v610_v61 = vand.u32 2147483648, %v1620_v34 }
 0x2ca   :  { %v573_v25 = vadd.f32 %v1629_v38, %v572_v2  ;;  %v602_v26 = vmul.f32 %v1636_v53, %v601_v8  ;;  %v616_v44 = vsub.f32 1.0, %v615_v22  ;;  %v1716_v2 = vpop.eup %1207  ;;  %v596_v4 = vor.u32 1.1754944e-38, %v595_v32 }
 0x2cb   :  { %v562_v41 = vsel %vm561_vm14, %v1196_v37, %v558_v57  ;;  %v647_v42 = vmul.f32 %v1204_v63, %v646_v15  ;;  %vm589_vm14 = vweird.f32 %v1617_v33  ;;  %v588_v52 = vadd.f32 %v1632_v50, %v587_v21 }
 0x2cc   :  { %v567_v18 = vsel %vm1645_vm12, %v566_v7, %v562_v41  ;;  %vm1675_vm12 = vcmp.eq.f32.partialorder %v578_v11, 8.507059e+37  ;;  %v603_v59 = vadd.f32 %v1636_v53, %v602_v26  ;;  %vm1711_vm10 = vmor %vm589_vm14, %vm590_vm8  ;;  %v625_v33 = vand.u32 2147483648, %v1626_v36 }
 0x2cd   :  { %v568_v54 = vmul.f32 %v1515_v60, %v567_v18  ;;  %v648_v37 = vadd.f32 %v1204_v63, %v647_v42  ;;  %v577_v60 = vsel %vm1671_vm11, %v1629_v38, %v573_v25  ;;  %v617_v7 = vmul.f32 %v1650_v5, %v616_v44 }
 0x2ce   :  { %v582_v58 = vsel %vm1675_vm12, %v581_v45, %v577_v60  ;;  %vm594_vm11 = vcmp.eq.f32.partialorder %v593_v31, 8.507059e+37  ;;  %v1736_v15 = vor.u32 1.1754944e-38, %v625_v33  ;;  %vm620_vm12 = vweird.f32 %v1650_v5 }
 0x2cf   :  { %796 = vperm.xlu1 %1127, %v568_v54   ;;  %v652_v55 = vsel %vm651_vm15, %v1204_v63, %v648_v37  ;;  %v583_v34 = vmul.f32 %v1513_v47, %v582_v58  ;;  %v1744_v25 = vadd.f32 %v1650_v5, %v617_v7  ;;  %v630_v20 = vmul.f32 %v1716_v2, %v1641_v56 }
 0x2d0   :  { %v1686_v51 = vpop.xlane.xlu2 %518  ;;  %v657_v35 = vsel %vm1652_vm13, %v656_v17, %v652_v55  ;;  %vm606_vm13 = vmor %vm604_vm9, %vm605_vm7  ;;  %vm609_vm7 = vcmp.eq.f32.partialorder %v608_v1, 8.507059e+37  ;;  %vm619_vm15 = vweird.f32 %v1626_v36 }
 0x2d1   :  { %v1692_v39 = vperm.slane %v1686_v51, 0  ;;  %v1695_v38 = vperm.slane %v1686_v51, 1  ;;  %v658_v62 = vmul.f32 %v1541_v12, %v657_v35  ;;  %v1706_v63 = vperm.slane %v1686_v51, 4 }
 0x2d2   :  { %v592_v12 = vsel %vm1711_vm10, %v1632_v50, %v588_v52  ;;  %v1726_v43 = vperm.slane %v1686_v51, 6  ;;  %v607_v57 = vsel %vm606_vm13, %v1636_v53, %v603_v59  ;;  %v1732_v8 = vperm.slane %v1686_v51, 7 }
 0x2d3   :  { %1209 = vrcp.f32 %v1692_v39  ;;  %826 = vperm.xlu2 %1128, %v658_v62   ;;  %v611_v50 = vor.u32 1.1754944e-38, %v610_v61  ;;  %v597_v10 = vsel %vm594_vm11, %v596_v4, %v592_v12  ;;  %v1739_v53 = vperm.slane %v1686_v51, 2 }
 0x2d4   :  { %1211 = vrcp.f32 %v1695_v38  ;;  %v698_v41 = vand.u32 2147483647, %v1695_v38  ;;  %v598_v18 = vmul.f32 %v1518_v40, %v597_v10  ;;  %v700_v21 = vand.u32 2147483648, %v1695_v38 }
 0x2d5   :  { %1213 = vrcp.f32 %v1706_v63  ;;  %v612_v11 = vsel %vm609_vm7, %v611_v50, %v607_v57  ;;  %v683_v54 = vand.u32 2147483647, %v1692_v39  ;;  %v1757_v9 = vperm.slane %v1686_v51, 3 }
 0x2d6   :  { %1215 = vrcp.f32 %v1726_v43  ;;  %v613_v26 = vmul.f32 %v1533_v6, %v612_v11  ;;  %vm694_vm14 = vweird.f32 %v1695_v38  ;;  %v685_v31 = vand.u32 2147483648, %v1692_v39 }
 0x2d7   :  { %801 = vperm.xlu1 %1127, %v583_v34   ;;  %1217 = vrcp.f32 %v1732_v8  ;;  %vm1765_vm8 = vcmp.eq.f32.partialorder %v698_v41, 8.507059e+37  ;;  %vm679_vm9 = vweird.f32 %v1692_v39  ;;  %v701_v45 = vor.u32 1.1754944e-38, %v700_v21 }
 0x2d8   :  { %1219 = vrcp.f32 %v1739_v53  ;;  %vm1774_vm11 = vcmp.eq.f32.partialorder %v683_v54, 8.507059e+37  ;;  %vm739_vm7 = vweird.f32 %v1706_v63  ;;  %v686_v61 = vor.u32 1.1754944e-38, %v685_v31 }
 0x2d9   :  { %v1210_v47 = vpop.eup %1209  ;;  %v743_v12 = vand.u32 2147483647, %v1706_v63  ;;  %v745_v4 = vand.u32 2147483648, %v1706_v63  ;;  %v631_v50 = vsub.f32 1.0, %v630_v20  ;;  %v790_v21 = vand.u32 2147483648, %v1732_v8 }
 0x2da   :  { %v1212_v17 = vpop.eup %1211  ;;  %v675_v22 = vmul.f32 %v1210_v47, %v1692_v39  ;;  %vm680_vm10 = vweird.f32 %v1210_v47  ;;  %1221 = vrcp.f32 %v1757_v9 }
 0x2db   :  { %v690_v42 = vmul.f32 %v1212_v17, %v1695_v38  ;;  %v1762_v37 = vpop.eup %1213  ;;  %vm695_vm13 = vweird.f32 %v1212_v17  ;;  %vm681_vm6 = vmor %vm679_vm9, %vm680_vm10  ;;  %v746_v6 = vor.u32 1.1754944e-38, %v745_v4  ;;  %vm635_vm10 = vweird.f32 %v1716_v2 }
 0x2dc   :  { %v676_v40 = vsub.f32 1.0, %v675_v22  ;;  %v735_v52 = vmul.f32 %v1762_v37, %v1706_v63  ;;  %v1772_v44 = vpop.eup %1215  ;;  %vm696_vm5 = vmor %vm694_vm14, %vm695_vm13  ;;  %vm740_vm9 = vweird.f32 %v1762_v37  ;;  %vm744_vm13 = vcmp.eq.f32.partialorder %v743_v12, 8.507059e+37 }
 0x2dd   :  { %v691_v60 = vsub.f32 1.0, %v690_v42  ;;  %v1218_v35 = vpop.eup %1217  ;;  %v765_v0 = vmul.f32 %v1772_v44, %v1726_v43  ;;  %vm1812_vm14 = vmor %vm739_vm7, %vm740_vm9  ;;  %vm770_vm7 = vweird.f32 %v1772_v44  ;;  %vm634_vm9 = vweird.f32 %v1641_v56 }
 0x2de   :  { %v677_v32 = vmul.f32 %v1210_v47, %v676_v40  ;;  %v736_v62 = vsub.f32 1.0, %v735_v52  ;;  %v780_v33 = vmul.f32 %v1218_v35, %v1732_v8  ;;  %v1789_v10 = vpop.eup %1219  ;;  %v632_v40 = vmul.f32 %v1716_v2, %v631_v50 }
 0x2df   :  { %806 = vperm.xlu1 %1127, %v598_v18   ;;  %v692_v55 = vmul.f32 %v1212_v17, %v691_v60  ;;  %v766_v7 = vsub.f32 1.0, %v765_v0  ;;  %v705_v60 = vmul.f32 %v1789_v10, %v1739_v53  ;;  %v713_v50 = vand.u32 2147483647, %v1739_v53 }
 0x2e0   :  { %v678_v58 = vadd.f32 %v1210_v47, %v677_v32  ;;  %v737_v57 = vmul.f32 %v1762_v37, %v736_v62  ;;  %v781_v41 = vsub.f32 1.0, %v780_v33  ;;  %v633_v32 = vadd.f32 %v1716_v2, %v632_v40 }
 0x2e1   :  { %v693_v1 = vadd.f32 %v1212_v17, %v692_v55  ;;  %v767_v20 = vmul.f32 %v1772_v44, %v766_v7  ;;  %v706_v36 = vsub.f32 1.0, %v705_v60 }
 0x2e2   :  { %v682_v34 = vsel %vm681_vm6, %v1210_v47, %v678_v58  ;;  %v738_v47 = vadd.f32 %v1762_v37, %v737_v57  ;;  %v782_v42 = vmul.f32 %v1218_v35, %v781_v41  ;;  %vm785_vm6 = vweird.f32 %v1218_v35 }
 0x2e3   :  { %v697_v11 = vsel %vm696_vm5, %v1212_v17, %v693_v1  ;;  %v687_v39 = vsel %vm1774_vm11, %v686_v61, %v682_v34  ;;  %v788_v17 = vand.u32 2147483647, %v1732_v8  ;;  %vm1805_vm5 = vmor %vm619_vm15, %vm620_vm12  ;;  %vm784_vm12 = vweird.f32 %v1732_v8 }
 0x2e4   :  { %v702_v18 = vsel %vm1765_vm8, %v701_v45, %v697_v11  ;;  %v688_v38 = vmul.f32 %v1560_v24, %v687_v39  ;;  %v742_v31 = vsel %vm1812_vm14, %v1762_v37, %v738_v47  ;;  %v783_v63 = vadd.f32 %v1218_v35, %v782_v42  ;;  %vm786_vm15 = vmor %vm784_vm12, %vm785_vm6 }
 0x2e5   :  { %v703_v22 = vmul.f32 %v1554_v19, %v702_v18  ;;  %v622_v19 = vsel %vm1805_vm5, %v1650_v5, %v1744_v25  ;;  %v791_v5 = vor.u32 1.1754944e-38, %v790_v21  ;;  %vm624_vm8 = vcmp.eq.f32.partialorder %v623_v13, 8.507059e+37  ;;  %v1222_v13 = vpop.eup %1221  ;;  %vm1849_vm5 = vmor %vm634_vm9, %vm635_vm10 }
 0x2e6   :  { %836 = vperm.xlu2 %1128, %v688_v38   ;;  %v787_v25 = vsel %vm786_vm15, %v1218_v35, %v783_v63  ;;  %vm789_vm11 = vcmp.eq.f32.partialorder %v788_v17, 8.507059e+37  ;;  %v1834_v37 = vperm.slane %v1686_v51, 5  ;;  %v747_v8 = vsel %vm744_vm13, %v746_v6, %v742_v31 }
 0x2e7   :  { %841 = vperm.xlu0 %1126, %v703_v22   ;;  %811 = vperm.xlu1 %1127, %v613_v26   ;;  %v627_v26 = vsel %vm624_vm8, %v1736_v15, %v622_v19  ;;  %v792_v45 = vsel %vm789_vm11, %v791_v5, %v787_v25  ;;  %v768_v52 = vadd.f32 %v1772_v44, %v767_v20  ;;  %v775_v15 = vand.u32 2147483648, %v1726_v43 }
 0x2e8   :  { %v793_v55 = vmul.f32 %v1572_v29, %v792_v45  ;;  %v628_v59 = vmul.f32 %v1527_v3, %v627_v26  ;;  %v640_v51 = vand.u32 2147483648, %v1641_v56  ;;  %v748_v35 = vmul.f32 %v1566_v27, %v747_v8 }
 0x2e9   :  { %vm769_vm6 = vweird.f32 %v1726_v43  ;;  %v773_v58 = vand.u32 2147483647, %v1726_v43  ;;  %v638_v29 = vand.u32 2147483647, %v1641_v56  ;;  %1223 = vrcp.f32 %v1834_v37 }
 0x2ea   :  { %vm771_vm14 = vmor %vm769_vm6, %vm770_vm7  ;;  %v637_v3 = vsel %vm1849_vm5, %v1716_v2, %v633_v32  ;;  %v707_v43 = vmul.f32 %v1789_v10, %v706_v36  ;;  %v720_v62 = vmul.f32 %v1222_v13, %v1757_v9  ;;  %v776_v0 = vor.u32 1.1754944e-38, %v775_v15 }
 0x2eb   :  { %v772_v27 = vsel %vm771_vm14, %v1772_v44, %v768_v52  ;;  %v641_v56 = vor.u32 1.1754944e-38, %v640_v51  ;;  %vm774_vm12 = vcmp.eq.f32.partialorder %v773_v58, 8.507059e+37  ;;  %vm639_vm15 = vcmp.eq.f32.partialorder %v638_v29, 8.507059e+37  ;;  %v1227_v29 = vld [vmem:[#allocation2 + $0x30] sm:$0xff] }
 0x2ec   :  { %v529_v1 = vperm.slane %v1610_v30, 7  ;;  %v777_v12 = vsel %vm774_vm12, %v776_v0, %v772_v27  ;;  %v708_v33 = vadd.f32 %v1789_v10, %v707_v43  ;;  %vm710_vm8 = vweird.f32 %v1789_v10  ;;  %v1228_v27 = vld [vmem:[#allocation2 + $0x40] sm:$0xff] }
 0x2ed   :  { %v642_v4 = vsel %vm639_vm15, %v641_v56, %v637_v3  ;;  %v721_v2 = vsub.f32 1.0, %v720_v62  ;;  %v715_v44 = vand.u32 2147483648, %v1739_v53  ;;  %v778_v57 = vmul.f32 %v1575_v14, %v777_v12  ;;  %v1229_v62 = vld [vmem:[#allocation2] sm:$0xff] }
 0x2ee   :  { %871 = vperm.xlu2 %1128, %v793_v55   ;;  %v643_v7 = vmul.f32 %v1547_v46, %v642_v4  ;;  %vm709_vm10 = vweird.f32 %v1739_v53  ;;  %1225 = vrcp.f32 %v529_v1  ;;  %vm714_vm11 = vcmp.eq.f32.partialorder %v713_v50, 8.507059e+37 }
 0x2ef   :  { %856 = vperm.xlu0 %1126, %v748_v35   ;;  %816 = vperm.xlu1 %1127, %v628_v59   ;;  %v1224_v34 = vpop.eup %1223  ;;  %vm711_vm13 = vmor %vm709_vm10, %vm710_vm8  ;;  %v722_v11 = vmul.f32 %v1222_v13, %v721_v2  ;;  %v716_v41 = vor.u32 1.1754944e-38, %v715_v44  ;;  %vm725_vm7 = vweird.f32 %v1222_v13  ;;  %v730_v47 = vand.u32 2147483648, %v1757_v9  ;;  %v1231_v44 = vld [vmem:[#allocation2 + $0x78] sm:$0xff] }
 0x2f0   :  { %v712_v30 = vsel %vm711_vm13, %v1789_v10, %v708_v33  ;;  %v750_v39 = vmul.f32 %v1224_v34, %v1834_v37  ;;  %vm724_vm9 = vweird.f32 %v1757_v9  ;;  %v728_v21 = vand.u32 2147483647, %v1757_v9 }
 0x2f1   :  { %v717_v18 = vsel %vm714_vm11, %v716_v41, %v712_v30  ;;  %v723_v38 = vadd.f32 %v1222_v13, %v722_v11  ;;  %vm726_vm6 = vmor %vm724_vm9, %vm725_vm7  ;;  %v731_v17 = vor.u32 1.1754944e-38, %v730_v47  ;;  %vm755_vm14 = vweird.f32 %v1224_v34  ;;  %v1232_v41 = vld [vmem:[#allocation2 + $0x48] sm:$0xff] }
 0x2f2   :  { %v751_v14 = vsub.f32 1.0, %v750_v39  ;;  %v718_v53 = vmul.f32 %v1544_v16, %v717_v18  ;;  %vm729_vm5 = vcmp.eq.f32.partialorder %v728_v21, 8.507059e+37  ;;  %v760_v20 = vand.u32 2147483648, %v1834_v37  ;;  %v1233_v21 = vld [vmem:[#allocation2 + $0x10] sm:$0xff] }
 0x2f3   :  { %v727_v10 = vsel %vm726_vm6, %v1222_v13, %v723_v38  ;;  %vm754_vm12 = vweird.f32 %v1834_v37  ;;  %v758_v16 = vand.u32 2147483647, %v1834_v37  ;;  %v670_v5 = vand.u32 2147483648, %v529_v1 }
 0x2f4   :  { %v1226_v46 = vpop.eup %1225  ;;  %v752_v22 = vmul.f32 %v1224_v34, %v751_v14  ;;  %v732_v54 = vsel %vm729_vm5, %v731_v17, %v727_v10  ;;  %vm756_vm15 = vmor %vm754_vm12, %vm755_vm14  ;;  %v761_v63 = vor.u32 1.1754944e-38, %v760_v20  ;;  %vm664_vm13 = vweird.f32 %v529_v1 }
 0x2f5   :  { %v660_v42 = vmul.f32 %v1226_v46, %v529_v1  ;;  %v733_v40 = vmul.f32 %v1569_v28, %v732_v54  ;;  %vm759_vm8 = vcmp.eq.f32.partialorder %v758_v16, 8.507059e+37  ;;  %vm665_vm10 = vweird.f32 %v1226_v46 }
 0x2f6   :  { %v753_v24 = vadd.f32 %v1224_v34, %v752_v22  ;;  %v668_v26 = vand.u32 2147483647, %v529_v1  ;;  %vm666_vm11 = vmor %vm664_vm13, %vm665_vm10  ;;  %v671_v8 = vor.u32 1.1754944e-38, %v670_v5  ;;  %v1884_v52 = vadd.s32 4294967264, %v1454_v49  ;;  %v1230_v1 = vld [vmem:[#allocation2 + $0x8] sm:$0xff] }
 0x2f7   :  { %866 = vperm.xlu0 %1126, %v778_v57   ;;  %821 = vperm.xlu1 %1127, %v643_v7   ;;  %v661_v19 = vsub.f32 1.0, %v660_v42  ;;  %vm2046_vm6 = vcmask 1046534   ;;  %vm1069_vm14 = vcmask 326912   ;;  %vm2048_vm12 = vcmask 1047559  }
 0x2f8   :  { %v757_v9 = vsel %vm756_vm15, %v1224_v34, %v753_v24  ;;  %vm669_vm7 = vcmp.eq.f32.partialorder %v668_v26, 8.507059e+37  ;;  %vm2047_vm5 = vmmov %vm2046_vm6 }
 0x2f9   :  { %v662_v31 = vmul.f32 %v1226_v46, %v661_v19  ;;  %v762_v60 = vsel %vm759_vm8, %v761_v63, %v757_v9 }
 0x2fa   :  { %v763_v25 = vmul.f32 %v1557_v23, %v762_v60  ;;  %v1235_v60 = vld [vmem:[#allocation2 + $0x60] sm:$0xff] }
 0x2fb   :  { %v663_v6 = vadd.f32 %v1226_v46, %v662_v31 }
 0x2fd   :  { %v667_v28 = vsel %vm666_vm11, %v1226_v46, %v663_v6 }
 0x2fe   :  { %v672_v37 = vsel %vm669_vm7, %v671_v8, %v667_v28  ;;  %v1237_v28 = vld [vmem:[#allocation2 + $0x20] sm:$0xff] }
 0x2ff   :  { %846 = vperm.xlu1 %1127, %v718_v53   ;;  %v673_v45 = vmul.f32 %v1530_v48, %v672_v37 }
 0x307   :  { %851 = vperm.xlu1 %1127, %v733_v40   ;;  %v1234_v40 = vld [vmem:[#allocation2 + $0x50] sm:$0xff] }
 0x30f   :  { %861 = vperm.xlu1 %1127, %v763_v25   ;;  %v1236_v25 = vld [vmem:[#allocation2 + $0x18] sm:$0xff] }
 0x317   :  { %831 = vperm.xlu1 %1127, %v673_v45  }
 0x32d   :  { %v1890_v51 = vpop.permute.xlu2 %826 }
 0x32e   :  { %v880_v3 = vmul.f32 %v1227_v29, %v1890_v51 }
 0x330   :  { %v932_v4 = vsel %vm74_vm0, %v880_v3, 0.0 }
 0x331   :  { %v933_v50 = vrot.slane %v932_v4, 4 }
 0x333   :  { %v934_v46 = vadd.f32 %v933_v50, %v932_v4 }
 0x335   :  { %v935_v24 = vrot.slane %v934_v46, 2 }
 0x340   :  { %v1897_v58 = vpop.permute.xlu2 %836 }
 0x341   :  { %v797_v32 = vpop.permute.xlu1 %796  ;;  %v882_v43 = vmul.f32 %v1228_v27, %v1897_v58 }
 0x342   :  { %v1037_v13 = vperm.slane %v797_v32, %v1884_v52  ;;  %v874_v0 = vmul.f32 %v1229_v62, %v797_v32  ;;  %v1238_v32 = vld [vmem:[#allocation2 + $0x70] sm:$0xff] }
 0x343   :  { %v946_v33 = vsel %vm74_vm0, %v882_v43, 0.0 }
 0x344   :  { %v890_v2 = vsel %vm74_vm0, %v874_v0, 0.0  ;;  %v947_v30 = vrot.slane %v946_v33, 4 }
 0x345   :  { %v891_v39 = vrot.slane %v890_v2, 4 }
 0x346   :  { %v948_v47 = vadd.f32 %v947_v30, %v946_v33 }
 0x347   :  { %v892_v53 = vadd.f32 %v891_v39, %v890_v2 }
 0x348   :  { %v1905_v56 = vpop.permute.xlu2 %871  ;;  %v949_v19 = vrot.slane %v948_v47, 2 }
 0x349   :  { %v802_v36 = vpop.permute.xlu1 %801  ;;  %v889_v57 = vmul.f32 %v1231_v44, %v1905_v56  ;;  %v893_v9 = vrot.slane %v892_v53, 2 }
 0x34a   :  { %v1038_v23 = vperm.slane %v802_v36, %v1884_v52  ;;  %v875_v12 = vmul.f32 %v1230_v1, %v802_v36  ;;  %v950_v29 = vadd.f32 %v949_v19, %v948_v47  ;;  %v1052_v19 = vperm.slane %v1905_v56, %v1884_v52 }
 0x34b   :  { %v995_v38 = vsel %vm74_vm0, %v889_v57, 0.0  ;;  %v894_v43 = vadd.f32 %v893_v9, %v892_v53  ;;  %v1043_v56 = vperm.slane %v1890_v51, %v1884_v52 }
 0x34c   :  { %v1053_v55 = vsel %vm306_vm1, %v1038_v23, %v1037_v13  ;;  %v897_v11 = vsel %vm74_vm0, %v875_v12, 0.0  ;;  %v996_v22 = vrot.slane %v995_v38, 4  ;;  %v1239_v13 = vld [vmem:[#allocation2 + $0x28] sm:$0xff] }
 0x34d   :  { %v898_v14 = vrot.slane %v897_v11, 4 }
 0x34e   :  { %v997_v5 = vadd.f32 %v996_v22, %v995_v38 }
 0x34f   :  { %v899_v17 = vadd.f32 %v898_v14, %v897_v11  ;;  %v1240_v11 = vld [vmem:[#allocation2 + $0x58] sm:$0xff] }
 0x350   :  { %v998_v12 = vrot.slane %v997_v5, 2 }
 0x351   :  { %v807_v59 = vpop.permute.xlu1 %806  ;;  %v900_v45 = vrot.slane %v899_v17, 2 }
 0x352   :  { %v1039_v15 = vperm.slane %v807_v59, %v1884_v52  ;;  %v876_v10 = vmul.f32 %v1233_v21, %v807_v59  ;;  %v1931_v59 = vadd.f32 %v935_v24, %v934_v46  ;;  %v999_v22 = vadd.f32 %v998_v12, %v997_v5 }
 0x353   :  { %v901_v4 = vadd.f32 %v900_v45, %v899_v17  ;;  %v1045_v24 = vperm.slane %v1897_v58, %v1884_v52 }
 0x354   :  { %v1893_v35 = vsel %vm308_vm2, %v1039_v15, %v1053_v55  ;;  %v904_v31 = vsel %vm74_vm0, %v876_v10, 0.0  ;;  %v937_v57 = vrot.slane %v1931_v59, 1  ;;  %v895_v10 = vrot.slane %v894_v43, 1 }
 0x355   :  { %v905_v15 = vrot.slane %v904_v31, 4  ;;  %v1000_v5 = vrot.slane %v999_v22, 1 }
 0x357   :  { %v906_v50 = vadd.f32 %v905_v15, %v904_v31 }
 0x359   :  { %v1895_v48 = vpop.permute.xlu1 %811  ;;  %v1899_v49 = vpop.permute.xlu0 %841 }
 0x35a   :  { %v883_v18 = vmul.f32 %v1232_v41, %v1899_v49  ;;  %v877_v26 = vmul.f32 %v1236_v25, %v1895_v48  ;;  %v951_v41 = vrot.slane %v950_v29, 1  ;;  %v1046_v58 = vperm.slane %v1899_v49, %v1884_v52 }
 0x35c   :  { %v953_v42 = vsel %vm74_vm0, %v883_v18, 0.0  ;;  %v911_v62 = vsel %vm74_vm0, %v877_v26, 0.0 }
 0x35d   :  { %v954_v63 = vrot.slane %v953_v42, 4  ;;  %v912_v38 = vrot.slane %v911_v62, 4 }
 0x35f   :  { %v955_v3 = vadd.f32 %v954_v63, %v953_v42  ;;  %v902_v42 = vrot.slane %v901_v4, 1  ;;  %v913_v31 = vadd.f32 %v912_v38, %v911_v62 }
 0x361   :  { %v1901_v61 = vpop.permute.xlu1 %816  ;;  %v1910_v34 = vpop.permute.xlu0 %856  ;;  %v956_v18 = vrot.slane %v955_v3, 2 }
 0x362   :  { %v886_v6 = vmul.f32 %v1235_v60, %v1910_v34  ;;  %v878_v8 = vmul.f32 %v1237_v28, %v1901_v61 }
 0x363   :  { %v957_v9 = vadd.f32 %v956_v18, %v955_v3  ;;  %v914_v3 = vrot.slane %v913_v31, 2 }
 0x364   :  { %v974_v27 = vsel %vm74_vm0, %v886_v6, 0.0  ;;  %v918_v0 = vsel %vm74_vm0, %v878_v8, 0.0  ;;  %v952_v6 = vadd.f32 %v951_v41, %v950_v29  ;;  %v896_v8 = vadd.f32 %v895_v10, %v894_v43 }
 0x365   :  { %v975_v30 = vrot.slane %v974_v27, 4  ;;  %v919_v14 = vrot.slane %v918_v0, 4  ;;  %v958_v15 = vrot.slane %v957_v9, 1  ;;  %v915_v41 = vadd.f32 %v914_v3, %v913_v31 }
 0x367   :  { %v920_v63 = vadd.f32 %v919_v14, %v918_v0  ;;  %v916_v31 = vrot.slane %v915_v41, 1 }
 0x369   :  { %v1913_v7 = vpop.permute.xlu1 %821  ;;  %v1921_v20 = vpop.permute.xlu0 %866 }
 0x36a   :  { %v888_v36 = vmul.f32 %v1238_v32, %v1921_v20  ;;  %v879_v23 = vmul.f32 %v1239_v13, %v1913_v7 }
 0x36c   :  { %v988_v33 = vsel %vm74_vm0, %v888_v36, 0.0  ;;  %v925_v2 = vsel %vm74_vm0, %v879_v23, 0.0  ;;  %v1241_v23 = vld [vmem:[#allocation2 + $0x68] sm:$0xff] }
 0x36d   :  { %v989_v46 = vrot.slane %v988_v33, 4  ;;  %v926_v47 = vrot.slane %v925_v2, 4 }
 0x36f   :  { %v990_v25 = vadd.f32 %v989_v46, %v988_v33  ;;  %v927_v26 = vadd.f32 %v926_v47, %v925_v2 }
 0x371   :  { %v1919_v54 = vpop.permute.xlu1 %846  ;;  %v991_v29 = vrot.slane %v990_v25, 2  ;;  %v928_v0 = vrot.slane %v927_v26, 2 }
 0x372   :  { %v884_v16 = vmul.f32 %v1234_v40, %v1919_v54  ;;  %v907_v40 = vrot.slane %v906_v50, 2 }
 0x373   :  { %v992_v46 = vadd.f32 %v991_v29, %v990_v25  ;;  %v929_v47 = vadd.f32 %v928_v0, %v927_v26 }
 0x374   :  { %v960_v37 = vsel %vm74_vm0, %v884_v16, 0.0  ;;  %v976_v16 = vadd.f32 %v975_v30, %v974_v27  ;;  %v908_v36 = vadd.f32 %v907_v40, %v906_v50  ;;  %v921_v27 = vrot.slane %v920_v63, 2  ;;  %v1242_v40 = vld [vmem:[#allocation2 + $0x38] sm:$0xff] }
 0x375   :  { %v961_v55 = vrot.slane %v960_v37, 4  ;;  %v1060_v50 = vsel %vm306_vm1, %v1046_v58, %v1045_v24  ;;  %v930_v25 = vrot.slane %v929_v47, 1  ;;  %v1040_v58 = vperm.slane %v1895_v48, %v1884_v52 }
 0x376   :  { %v977_v13 = vrot.slane %v976_v16, 2  ;;  %v922_v18 = vadd.f32 %v921_v27, %v920_v63  ;;  %v909_v14 = vrot.slane %v908_v36, 1 }
 0x377   :  { %v962_v1 = vadd.f32 %v961_v55, %v960_v37  ;;  %v903_v37 = vadd.f32 %v902_v42, %v901_v4  ;;  %v1047_v4 = vperm.slane %v1919_v54, %v1884_v52  ;;  %v1049_v54 = vperm.slane %v1910_v34, %v1884_v52 }
 0x378   :  { %v978_v30 = vadd.f32 %v977_v13, %v976_v16  ;;  %v923_v63 = vrot.slane %v922_v18, 1  ;;  %v993_v34 = vrot.slane %v992_v46, 1 }
 0x379   :  { %v1938_v44 = vpop.permute.xlu1 %851  ;;  %v963_v53 = vrot.slane %v962_v1, 2  ;;  %v1018_v49 = vsel %vm306_vm1, %v903_v37, %v896_v8 }
 0x37a   :  { %v885_v39 = vmul.f32 %v1240_v11, %v1938_v44  ;;  %v1048_v11 = vperm.slane %v1938_v44, %v1884_v52  ;;  %v924_v27 = vadd.f32 %v923_v63, %v922_v18  ;;  %v994_v29 = vadd.f32 %v993_v34, %v992_v46 }
 0x37b   :  { %v964_v28 = vadd.f32 %v963_v53, %v962_v1  ;;  %v1001_v1 = vadd.f32 %v1000_v5, %v999_v22 }
 0x37c   :  { %v967_v21 = vsel %vm74_vm0, %v885_v39, 0.0  ;;  %v959_v39 = vadd.f32 %v958_v15, %v957_v9 }
 0x37d   :  { %v968_v17 = vrot.slane %v967_v21, 4  ;;  %v965_v12 = vrot.slane %v964_v28, 1 }
 0x37e   :  { %v1025_v9 = vsel %vm306_vm1, %v959_v39, %v952_v6  ;;  %vm2044_vm1 = vcmask 1045509  }
 0x37f   :  { %v969_v60 = vadd.f32 %v968_v17, %v967_v21  ;;  %v966_v53 = vadd.f32 %v965_v12, %v964_v28  ;;  %v1061_v21 = vsel %vm308_vm2, %v1047_v4, %v1060_v50  ;;  %v979_v17 = vrot.slane %v978_v30, 1  ;;  %vm2045_vm9 = vmmov %vm2044_vm1 }
 0x380   :  { %v1062_v44 = vsel %vm310_vm3, %v1048_v11, %v1061_v21  ;;  %vm2050_vm15 = vmmov %vm2044_vm1 }
 0x381   :  { %v970_v45 = vrot.slane %v969_v60, 2  ;;  %v862_v32 = vpop.permute.xlu1 %861  ;;  %v1026_v26 = vsel %vm308_vm2, %v966_v53, %v1025_v9  ;;  %v1063_v37 = vsel %vm312_vm4, %v1049_v54, %v1062_v44  ;;  %v980_v6 = vadd.f32 %v979_v17, %v978_v30 }
 0x382   :  { %v887_v55 = vmul.f32 %v1241_v23, %v862_v32  ;;  %v1050_v24 = vperm.slane %v862_v32, %v1884_v52  ;;  %v910_v32 = vadd.f32 %v909_v14, %v908_v36  ;;  %v917_v23 = vadd.f32 %v916_v31, %v915_v41 }
 0x383   :  { %v971_v62 = vadd.f32 %v970_v45, %v969_v60  ;;  %v931_v36 = vadd.f32 %v930_v25, %v929_v47  ;;  %v1055_v30 = vsel %vm310_vm3, %v1040_v58, %v1893_v35  ;;  %v938_v35 = vadd.f32 %v937_v57, %v1931_v59 }
 0x384   :  { %v981_v43 = vsel %vm74_vm0, %v887_v55, 0.0  ;;  %v1064_v13 = vsel %vm2044_vm1, %v1050_v24, %v1063_v37  ;;  %v1051_v55 = vperm.slane %v1921_v20, %v1884_v52  ;;  %v1019_v4 = vsel %vm308_vm2, %v910_v32, %v1018_v49  ;;  %vm2049_vm2 = vmmov %vm2048_vm12 }
 0x385   :  { %v972_v33 = vrot.slane %v971_v62, 1  ;;  %v982_v2 = vrot.slane %v981_v43, 4  ;;  %v1042_v20 = vperm.slane %v1913_v7, %v1884_v52  ;;  %vm2054_vm10 = vmmov %vm2049_vm2 }
 0x386   :  { %v1065_v48 = vsel %vm2046_vm6, %v1051_v55, %v1064_v13  ;;  %vm2055_vm13 = vmmov %vm2049_vm2 }
 0x387   :  { %v983_v38 = vadd.f32 %v982_v2, %v981_v43  ;;  %v973_v10 = vadd.f32 %v972_v33, %v971_v62  ;;  %v1041_v62 = vperm.slane %v1901_v61, %v1884_v52  ;;  %v1020_v2 = vsel %vm310_vm3, %v917_v23, %v1019_v4 }
 0x388   :  { %v1021_v11 = vsel %vm312_vm4, %v924_v27, %v1020_v2  ;;  %v1066_v7 = vsel %vm2049_vm2, %v1052_v19, %v1065_v48 }
 0x389   :  { %v984_v22 = vrot.slane %v983_v38, 2  ;;  %v1959_v42 = vpop.permute.xlu1 %831  ;;  %v1027_v8 = vsel %vm310_vm3, %v973_v10, %v1026_v26  ;;  %v1056_v49 = vsel %vm312_vm4, %v1041_v62, %v1055_v30  ;;  %v1022_v39 = vsel %vm2050_vm15, %v931_v36, %v1021_v11  ;;  %vm2051_vm3 = vmmov %vm2044_vm1 }
 0x38a   :  { %v881_v16 = vmul.f32 %v1242_v40, %v1959_v42  ;;  %v1028_v0 = vsel %vm312_vm4, %v980_v6, %v1027_v8  ;;  %v1044_v18 = vperm.slane %v1959_v42, %v1884_v52  ;;  %vm2052_vm4 = vmmov %vm2047_vm5 }
 0x38b   :  { %v985_v60 = vadd.f32 %v984_v22, %v983_v38  ;;  %v1023_v38 = vsel %vm2052_vm4, %v938_v35, %v1022_v39  ;;  %vm2053_vm8 = vmmov %vm2052_vm4 }
 0x38c   :  { %v939_v28 = vsel %vm74_vm0, %v881_v16, 0.0 }
 0x38d   :  { %v986_v5 = vrot.slane %v985_v60, 1  ;;  %v940_v45 = vrot.slane %v939_v28, 4 }
 0x38f   :  { %v987_v15 = vadd.f32 %v986_v5, %v985_v60  ;;  %v941_v3 = vadd.f32 %v940_v45, %v939_v28 }
 0x391   :  { %v1029_v12 = vsel %vm2045_vm9, %v987_v15, %v1028_v0  ;;  %v942_v43 = vrot.slane %v941_v3, 2 }
 0x392   :  { %v1030_v33 = vsel %vm2047_vm5, %v994_v29, %v1029_v12 }
 0x393   :  { %v943_v61 = vadd.f32 %v942_v43, %v941_v3  ;;  %v1031_v50 = vsel %vm2048_vm12, %v1001_v1, %v1030_v33  ;;  %v1057_v1 = vsel %vm2051_vm3, %v1042_v20, %v1056_v49 }
 0x394   :  { %1035 = vst.msk [vmem:[#allocation7 + $0x8] sm:$0xff] %vm74_vm0, %v1031_v50  ;;  %v1058_v14 = vsel %vm2053_vm8, %v1043_v56, %v1057_v1 }
 0x395   :  { %v944_v41 = vrot.slane %v943_v61, 1  ;;  %1071 = vst.msk [vmem:[#allocation7 + $0x8] sm:$0xff] %vm1069_vm14, %v1066_v7  ;;  %v1059_v57 = vsel %vm2055_vm13, %v1044_v18, %v1058_v14 }
 0x397   :  { %v945_v19 = vadd.f32 %v944_v41, %v943_v61 }
 0x399   :  { %v1024_v59 = vsel %vm2054_vm10, %v945_v19, %v1023_v38 }
 0x39a   :  { %1034 = vst.msk [vmem:[#allocation7] sm:$0xff] %vm74_vm0, %v1024_v59 }
 0x39b   :  { %1070 = vst.msk [vmem:[#allocation7] sm:$0xff] %vm1069_vm14, %v1059_v57 }
 0x39c   :  { %1084 = dma.vmem_to_hbm [thread:$0]  %s1077_s3, 256, %s1079_s5, [#allocation4], %s1322_s23, %s1322_s23, %s1323_s24  }
 0x39d   :  { %1319 = dma.done.wait [#allocation4], 256  }
 0x39e   :  { %1320 = vsyncadd [#allocation4], 4294967040 }
 0x39f   :  { %1089 = vsyncpa [#allocation3], 1 }
 0x3a0   :  { %1090 = vsyncpa [#allocation6], 1 }
 0x3a1   :  { %1091 = vsyncpa [#allocation4], 1 }

</bundles_post_ra>
